<compile_context>
chip_gen: v7x
topology: tpu7x:2x2x1
jax: 0.10.0
libtpu: 0.0.40
codegen_flags: <defaults>
</compile_context>

<pallas_src>
import jax
import jax.numpy as jnp
from jax import lax
from jax.experimental import pallas as pl
from jax.experimental.pallas import tpu as pltpu


def _round_up(v, m):
    return ((v + m - 1) // m) * m


def _shared_linear_kernel(x_ref, w_ref, b_ref, o_ref):
    # x_ref: (TB, C_in), w_ref: (TN, C_in), b_ref: (1, TN), o_ref: (TB, TN)
    acc = lax.dot_general(
        x_ref[...], w_ref[...],
        dimension_numbers=(((1,), (1,)), ((), ())),   # x @ W^T without materializing W^T
        preferred_element_type=jnp.float32,
    )
    o_ref[...] = (acc + b_ref[...]).astype(o_ref.dtype)


def _vmem_limit_bytes():
    """Generation-aware scoped-VMEM request (v7x: 64 MiB/TC, v5e/v6e: 128 MiB)."""
    try:
        cap = int(pltpu.get_tpu_info().vmem_capacity_bytes)
    except Exception:
        cap = 64 * 1024 * 1024            # conservative (v7x-sized) fallback
    # 64 MiB is already far past the point where bigger tiles stop helping; it also
    # keeps the request legal on v7x where the reported capacity is only 64 MiB.
    return min(int(cap * 0.75), 64 * 1024 * 1024)


def _plan_tiles(B, c_in, c_out_p, x_itemsize, w_itemsize, out_itemsize, vmem_limit):
    """Pick (tb, tn).  Weight stays fully resident unless it would eat >25% of VMEM."""
    headroom = 2 * 1024 * 1024
    w_bytes = c_out_p * c_in * w_itemsize

    # --- c_out tiling: only as a fallback for very large weights -------------------
    tn = c_out_p
    if w_bytes > vmem_limit // 4 and c_out_p >= 256 and c_out_p % 128 == 0:
        tn_budget = max(vmem_limit // 4, 2 * 128 * c_in * w_itemsize)
        tn = max(128, (tn_budget // (2 * c_in * w_itemsize)) // 128 * 128)
        tn = min(tn, c_out_p)
    weight_resident = (tn == c_out_p)
    w_buffers = 1 if weight_resident else 2
    resident_bytes = w_buffers * (tn * c_in * w_itemsize + tn * 4)

    # --- batch tiling: biggest sublane-aligned tile fitting the remaining budget ---
    remaining = max(vmem_limit - resident_bytes - headroom, 512 * 1024)
    per_row = 2 * (c_in * x_itemsize + tn * out_itemsize)   # double-buffered x + out tiles
    tb = min(B, 8192, max(8, remaining // max(per_row, 1)))
    if B >= 32:
        # Keep >= 4 grid steps so v7x's two TensorCores both get work (neutral on v5e/v6e:
        # per-step overhead is only ~0.35 us).
        tb = min(tb, _round_up(pl.cdiv(B, 4), 8))
    if tb < B:
        tb = max(8, (tb // 8) * 8)       # sublane-aligned tile
    else:
        tb = B                           # full-array block: always legal
    return tb, tn


def shared_linear(x, weight, bias=None, *, block_b=None, block_n=None,
                  stream_dtype=None, allow_xla_fallback=False, interpret=False):
    """y = x @ weight[:, :, 0].T + bias  (== Conv1d(k=1) applied to (B, C_in, 1)).

    Args:
      x:      (B, C_in)
      weight: (C_out, C_in, 1)  (PyTorch Conv1d weight layout)
      bias:   (C_out,) or None
      stream_dtype: optional dtype (e.g. jnp.bfloat16) for x / weight streaming;
                    accumulation and bias epilogue stay f32.
    Returns:
      (B, C_out), dtype of x.
    """
    B, c_in = x.shape
    c_out = weight.shape[0]
    w2d = weight.reshape(c_out, c_in)         # squeeze trailing k=1; no transpose

    if bias is None:
        bias = jnp.zeros((c_out,), jnp.float32)

    # Tiny problems: kernel launch + wrapper ops dominate — fused XLA dot is faster.
    if allow_xla_fallback and B * c_out <= 16384:
        return (x @ w2d.T + bias.astype(jnp.float32)).astype(x.dtype)

    # Optional bf16 streaming halves HBM traffic on this memory-bound op.
    x_s = x if stream_dtype is None else x.astype(stream_dtype)
    w_s = w2d if stream_dtype is None else w2d.astype(stream_dtype)

    # Lane padding only when it pays: full-extent last blocks are legal, so narrow or
    # already-aligned c_out stays unpadded (avoids pad + wrapper-slice HBM traffic).
    if c_out >= 128 and c_out % 128 != 0:
        c_out_p = _round_up(c_out, 128)
        w_s = jnp.pad(w_s, ((0, c_out_p - c_out), (0, 0)))
        b2d = jnp.pad(bias.astype(jnp.float32), (0, c_out_p - c_out)).reshape(1, c_out_p)
    else:
        c_out_p = c_out
        b2d = bias.astype(jnp.float32).reshape(1, c_out)

    out_dtype = x.dtype
    vmem_limit = _vmem_limit_bytes()
    tb, tn = _plan_tiles(B, c_in, c_out_p,
                         jnp.dtype(x_s.dtype).itemsize,
                         jnp.dtype(w_s.dtype).itemsize,
                         jnp.dtype(out_dtype).itemsize,
                         vmem_limit)
    if block_b is not None:
        tb = block_b
    if block_n is not None:
        tn = block_n

    nn = pl.cdiv(c_out_p, tn)
    nb = pl.cdiv(B, tb)
    weight_resident = (nn == 1)

    # Resident operands (constant index maps) don't need double buffering.
    w_mode = pl.Buffered(1) if weight_resident else None
    b_mode = pl.Buffered(1) if weight_resident else None

    # Weight axis is the OUTER grid axis: each weight tile is DMA'd once while batch
    # tiles stream underneath it. Both axes are independent -> "parallel" for v7x TCs.
    grid = (nn, nb)
    in_specs = [
        pl.BlockSpec((tb, c_in), lambda j, i: (i, 0)),                        # streamed x
        pl.BlockSpec((tn, c_in), lambda j, i: (j, 0), pipeline_mode=w_mode),  # weight
        pl.BlockSpec((1, tn), lambda j, i: (0, j), pipeline_mode=b_mode),     # bias
    ]
    out_specs = pl.BlockSpec((tb, tn), lambda j, i: (i, j))

    itemsize_x = jnp.dtype(x_s.dtype).itemsize
    itemsize_w = jnp.dtype(w_s.dtype).itemsize
    itemsize_o = jnp.dtype(out_dtype).itemsize
    flops = 2 * B * c_in * c_out_p
    bytes_accessed = (B * c_in * itemsize_x + c_out_p * c_in * itemsize_w
                      + c_out_p * 4 + B * c_out_p * itemsize_o)

    y = pl.pallas_call(
        _shared_linear_kernel,
        out_shape=jax.ShapeDtypeStruct((B, c_out_p), out_dtype),
        grid_spec=pltpu.PrefetchScalarGridSpec(
            num_scalar_prefetch=0,
            grid=grid,
            in_specs=in_specs,
            out_specs=out_specs,
        ),
        compiler_params=pltpu.CompilerParams(
            dimension_semantics=("parallel", "parallel"),
            vmem_limit_bytes=vmem_limit,
        ),
        cost_estimate=pl.CostEstimate(
            flops=flops, transcendentals=0, bytes_accessed=bytes_accessed),
        interpret=interpret,
    )(x_s, w_s, b2d)

    if c_out_p != c_out:
        y = y[:, :c_out]
    return y


if __name__ == "__main__":
    key = jax.random.PRNGKey(0)

    def init_params(k, c_in, c_out):
        kw, kb = jax.random.split(k)
        bound = 1.0 / (c_in ** 0.5)
        w = jax.random.uniform(kw, (c_out, c_in, 1), jnp.float32, -bound, bound)
        b = jax.random.uniform(kb, (c_out,), jnp.float32, -bound, bound)
        return w, b

    k1, k2, kx1, kx2 = jax.random.split(key, 4)

    # Case 1: module-sized shapes (B=8, in=32, out=64) — narrow c_out -> unpadded path.
    w1, b1 = init_params(k1, 32, 64)
    x1 = jax.random.normal(kx1, (8, 32), jnp.float32)
    y1 = jax.block_until_ready(shared_linear(x1, w1, b1))
    ref1 = x1 @ w1[:, :, 0].T + b1
    assert y1.shape == (8, 64), y1.shape
    assert jnp.allclose(y1, ref1, atol=2e-5, rtol=2e-5)

    # Case 2: misaligned c_out >= 128 and B not divisible by the batch tile — exercises
    # the pad-to-128 path and masked partial final batch block.
    w2, b2 = init_params(k2, 32, 200)
    x2 = jax.random.normal(kx2, (37, 32), jnp.float32)
    y2 = jax.block_until_ready(shared_linear(x2, w2, b2))
    ref2 = x2 @ w2[:, :, 0].T + b2
    assert y2.shape == (37, 200), y2.shape
    assert jnp.allclose(y2, ref2, atol=2e-5, rtol=2e-5)

    print("KERNEL_OK")
</pallas_src>

<mosaic_0001>
module attributes {stable_mosaic.version = 11 : i64} {
  func.func @_shared_linear_kernel(%arg0: i32, %arg1: i32, %arg2: memref<8x32xf32, #tpu.memory_space<vmem>>, %arg3: memref<64x32xf32, #tpu.memory_space<vmem>>, %arg4: memref<1x64xf32, #tpu.memory_space<vmem>>, %arg5: memref<8x64xf32, #tpu.memory_space<vmem>>) attributes {dimension_semantics = [#tpu.dimension_semantics<parallel>, #tpu.dimension_semantics<parallel>], iteration_bounds = array<i64: 1, 1>, scalar_prefetch = 0 : i64, scratch_operands = 0 : i64, tpu.core_type = #tpu.core_type<tc>, window_params = [{transform_indices = @transform_0, window_bounds = array<i64: 8, 32>}, {pipeline_mode = #tpu.pipeline_mode<synchronous>, transform_indices = @transform_1, window_bounds = array<i64: 64, 32>}, {pipeline_mode = #tpu.pipeline_mode<synchronous>, transform_indices = @transform_2, window_bounds = array<i64: 1, 64>}, {transform_indices = @transform_3, window_bounds = array<i64: 8, 64>}]} {
    %c0 = arith.constant 0 : index
    %c0_0 = arith.constant 0 : index
    %0 = vector.load %arg2[%c0, %c0_0] : memref<8x32xf32, #tpu.memory_space<vmem>>, vector<8x32xf32>
    %c0_1 = arith.constant 0 : index
    %c0_2 = arith.constant 0 : index
    %1 = vector.load %arg3[%c0_1, %c0_2] : memref<64x32xf32, #tpu.memory_space<vmem>>, vector<64x32xf32>
    %cst = arith.constant dense<0.000000e+00> : vector<8x64xf32>
    %2 = tpu.matmul %0, %1, %cst {dimension_numbers = #tpu.dot_dimension_numbers<[1], [1], [0], [0], [0, 0, 1, 0], [], []>} : vector<8x32xf32>, vector<64x32xf32>, vector<8x64xf32> -> vector<8x64xf32>
    %c0_3 = arith.constant 0 : index
    %c0_4 = arith.constant 0 : index
    %3 = vector.load %arg4[%c0_3, %c0_4] : memref<1x64xf32, #tpu.memory_space<vmem>>, vector<1x64xf32>
    %4 = vector.broadcast %3 : vector<1x64xf32> to vector<8x64xf32>
    %5 = arith.addf %2, %4 : vector<8x64xf32>
    %c0_5 = arith.constant 0 : index
    %c0_6 = arith.constant 0 : index
    %6 = vector.load %arg5[%c0_5, %c0_6] : memref<8x64xf32, #tpu.memory_space<vmem>>, vector<8x64xf32>
    tpu.vector_store %arg5[%c0_5, %c0_6], %5 {strides = array<i32>} : memref<8x64xf32, #tpu.memory_space<vmem>>, vector<8x64xf32>,
    return
  }
  func.func @transform_0(%arg0: i32, %arg1: i32) -> (i32, i32) {
    %c0_i32 = arith.constant 0 : i32
    %c0_i32_0 = arith.constant 0 : i32
    return %arg1, %c0_i32 : i32, i32
  }
  func.func @transform_1(%arg0: i32, %arg1: i32) -> (i32, i32) {
    %c0_i32 = arith.constant 0 : i32
    %c0_i32_0 = arith.constant 0 : i32
    return %arg0, %c0_i32 : i32, i32
  }
  func.func @transform_2(%arg0: i32, %arg1: i32) -> (i32, i32) {
    %c0_i32 = arith.constant 0 : i32
    %c0_i32_0 = arith.constant 0 : i32
    return %c0_i32, %arg0 : i32, i32
  }
  func.func @transform_3(%arg0: i32, %arg1: i32) -> (i32, i32) {
    %c0_i32 = arith.constant 0 : i32
    return %arg1, %arg0 : i32, i32
  }
}

</mosaic_0001>

<bundles_post_ra>
// kernel: tpu_custom_call.1
= control target key start
LH: loop header
LB: loop body
LE: loop exit
PB: predicated region body
PF: predicated region fallthrough
CT: control target
= control target key end

     0   :  { %vm31_vm0 = vcmask 261120   ;;  %v227_v2 = vmov 0.0|0.0   ;;  %vm228_vm2 = vmmov 0   ;;  %v229_v5 = vmov 0.0   ;;  %s308_s0 = inlined_call_operand.vmem [shape: f32[8,32], index: 0, kind: input, shape index: {}]   ;;  %s309_s1 = inlined_call_operand.vmem [shape: f32[64,32], index: 1, kind: input, shape index: {}]   ;;  %s310_s2 = inlined_call_operand.vmem [shape: f32[1,64], index: 2, kind: input, shape index: {}]   ;;  %s311_s3 = inlined_call_operand.hbm [shape: f32[8,64], index: 3, kind: output, shape index: {}]  }
   0x1   :  { %v16_v0 = vld [vmem:[%s309_s1] sm:$0xff]  ;;  %v17_v1 = vld [vmem:[%s309_s1 + $0x8] sm:$0xff]  ;;  %183 = vmatprep.subr.bf16.mxu0 %v227_v2  ;;  %vm259_vm1 = vmpackc.low %vm31_vm0, %vm31_vm0  ;;  %180 = vmatprep.mubr.msk.f32.mxu0 %vm228_vm2, %v229_v5 }
   0x2   :  { %v184_v3 = vpack.c.bf16 %v17_v1, %v16_v0 }
   0x4   :  { %186 = vmatpush3.bf16.xpose.msk.msra.mxu0 %vm259_vm1, %v184_v3 }
   0x5   :  { %8 = vsyncpa [#allocation3], 0  ;;  %187 = vmatprep.subr.bf16.mxu0 %v227_v2  ;;  %v18_v6 = vld [vmem:[%s309_s1 + $0x10] sm:$0xff]  ;;  %v19_v7 = vld [vmem:[%s309_s1 + $0x18] sm:$0xff]  ;;  %s230_s5 = smov [#allocation2]   ;;  %vm129_vm3 = vcmask 523264  }
   0x6   :  { %v188_v8 = vpack.c.bf16 %v19_v7, %v18_v6  ;;  %v20_v9 = vld [vmem:[%s309_s1 + $0x20] sm:$0xff]  ;;  %v21_v10 = vld [vmem:[%s309_s1 + $0x28] sm:$0xff]  ;;  %v22_v12 = vld [vmem:[%s309_s1 + $0x30] sm:$0xff]  ;;  %s137_s6 = sshll.u32 %s230_s5, 4  ;;  %s138_s6 = int_to_ptr.vmem [resolvable:$true] %s137_s6 }
   0x7   :  { %v192_v11 = vpack.c.bf16 %v21_v10, %v20_v9  ;;  %v23_v13 = vld [vmem:[%s309_s1 + $0x38] sm:$0xff]  ;;  %v15_v15 = vld [vmem:[%s308_s0] sm:$0xff]  ;;  %s203_s1 = scalar_lea.vmem %s138_s6, 128  ;;  %p208_p1 = scmp.lt.s32.totalorder %s138_s6, %s138_s6 }
   0x8   :  { %v196_v14 = vpack.c.bf16 %v23_v13, %v22_v12  ;;  %v145_v16 = vld [vmem:[%s310_s2] ss:$0 sm:$0xff]  ;;  %p204_p0 = scmp.ne.s32.totalorder %s138_s6, %s203_s1  ;;  %p209_p2 = scmp.lt.s32.totalorder %s203_s1, %s203_s1 }
   0xa   :  { %p210_p3 = por %p209_p2, %p208_p1 }
   0xc   :  { %190 = vmatpush3.bf16.xpose.msk.msra.mxu0 %vm259_vm1, %v188_v8  ;;  %p211_p4 = pnand %p210_p3, %p204_p0 }
   0xd   :  { %191 = vmatprep.subr.bf16.mxu0 %v227_v2 }
  0x14   :  { %194 = vmatpush3.bf16.xpose.msk.msra.mxu0 %vm259_vm1, %v192_v11 }
  0x15   :  { %195 = vmatprep.subr.bf16.mxu0 %v227_v2 }
  0x1c   :  { %198 = vmatpush3.bf16.xpose.msk.msra.mxu0 %vm259_vm1, %v196_v14 }
  0x23   :  { %181 = vmatmul.mubr.msk.f32.vlgmr.msra.gmra.mrb[0].mxu0 %vm31_vm0, %v15_v15 }
  0xf6   :  { %v125_v17 = vpop.f32.mrb[0].mxu0 }
  0xf7   :  { %v126_v18 = vadd.f32 %v145_v16, %v125_v17  ;;  %v182_v19 = vpop.f32.mrb[1].mxu0 }
  0xf9   :  { %130 = vst.msk [vmem:[#allocation2] sm:$0xff] %vm129_vm3, %v126_v18 }
  0xfa   :  { %214 = shalt.err (!%p211_p4)
}
  0xfb   :  { %s215_s8 = scalar_lea.hbm %s311_s3, 128 }
  0xfc   :  { %p216_p5 = scmp.ne.s32.totalorder %s311_s3, %s215_s8  ;;  %p219_p6 = scmp.lt.u32.totalorder %s215_s8, %s311_s3 }
  0xfe   :  { %p221_p7 = pnand %p219_p6, %p216_p5 }
 0x100   :  { %224 = shalt.err (!%p221_p7)
}
 0x101   :  { %140 = dma.vmem_to_hbm [thread:$0]  %s138_s6, 128, %s311_s3, [#allocation3]  }
 0x102   :  { %225 = dma.done.wait [#allocation3], 128  }
 0x103   :  { %226 = vsyncadd [#allocation3], 4294967168 }
 0x104   :  { %144 = vsyncpa [#allocation3], 1 }

</bundles_post_ra>
